<compile_context>
chip_gen: v7x
topology: tpu7x:2x2x1
jax: 0.10.0
libtpu: 0.0.40
codegen_flags: <defaults>
</compile_context>

<pallas_src>
import jax
import jax.numpy as jnp
from jax import lax
from jax.experimental import pallas as pl
from jax.experimental.pallas import tpu as pltpu

_BN_EPS = 1e-5
_VMEM_LIMIT = 48 * 1024 * 1024      # explicit scoped-VMEM budget (fits v5e/v6e/v7x)
_SPATIAL_TILE = 1024                # target rows per block (512-2048 sweet spot)


# ----------------------------- Pallas kernels --------------------------------------

def _silu_f32(y):
    # y * sigmoid(y); reciprocal goes to the EUP slot.
    return y * pl.reciprocal(1.0 + jnp.exp(-y), approx=True)


def _conv1x1_silu_kernel(x_ref, w_ref, b_ref, o_ref):
    """1x1 conv (matmul) + folded-BN bias + SiLU.

    x_ref: [1, TN, Cin] bf16   w_ref: [Cin, D] bf16   b_ref: [1, D] f32
    o_ref: [1, TN, D]  bf16
    """
    y = jnp.dot(x_ref[0], w_ref[...], preferred_element_type=jnp.float32) + b_ref[...]
    o_ref[0] = _silu_f32(y).astype(o_ref.dtype)


def _downsample_fused_kernel(xs4_ref, w1_ref, b1_ref, taps_ref, w2_ref, b2_ref, o_ref):
    """Fused: [branch1: 2x2 maxpool + 1x1 conv + SiLU] and [branch2b: 3x3/s2 conv + SiLU].

    xs4_ref : [4, 1, TH, Wo, Cin] bf16   (the 4 pool taps, window-major)
    w1_ref  : [Cin, D] bf16   b1_ref: [1, D] f32
    taps_ref: [6, 1, TH, Wo+1, D] bf16   (row-tap kh x col-parity planes of padded y)
    w2_ref  : [9, D, D] bf16  b2_ref: [1, D] f32
    o_ref   : [1, TH, Wo, 2*D] f32       (x1 -> channels [:D], x2 -> channels [D:])
    """
    TH, Wo, Cin = xs4_ref.shape[2], xs4_ref.shape[3], xs4_ref.shape[4]
    D = w1_ref.shape[1]

    # ---- branch 1: max-pool as 3 elementwise maxima (VPU), then 1x1 conv + SiLU ----
    pooled = jnp.maximum(jnp.maximum(xs4_ref[0, 0], xs4_ref[1, 0]),
                         jnp.maximum(xs4_ref[2, 0], xs4_ref[3, 0]))        # [TH, Wo, Cin]
    y1 = jnp.dot(pooled.reshape(TH * Wo, Cin), w1_ref[...],
                 preferred_element_type=jnp.float32) + b1_ref[...]
    y1 = _silu_f32(y1)

    # ---- branch 2b: 3x3 stride-2 conv = 9 accumulated matmuls over tap planes ----
    acc = jnp.zeros((TH * Wo, D), jnp.float32)
    for kh in range(3):
        for kw in range(3):
            # plane 2*kh + (kw % 2) holds padded rows kh+2*ho / columns of parity kw%2;
            # column offset kw//2 selects 2*wo+kw within that plane (unit stride).
            tap = taps_ref[2 * kh + (kw % 2), 0, :, pl.ds(kw // 2, Wo), :]  # [TH, Wo, D]
            acc += jnp.dot(tap.reshape(TH * Wo, D), w2_ref[3 * kh + kw],
                           preferred_element_type=jnp.float32)
    y2 = _silu_f32(acc + b2_ref[...])

    # write both branches straight into the channel halves of the fused output
    o_ref[0, :, :, :D] = y1.reshape(TH, Wo, D)
    o_ref[0, :, :, D:] = y2.reshape(TH, Wo, D)


# ----------------------------- pallas_call wrappers ---------------------------------

def _compiler_params():
    return pltpu.CompilerParams(dimension_semantics=("parallel", "parallel"),
                                vmem_limit_bytes=_VMEM_LIMIT)


def _call_conv1x1(x_flat, w, b, tile_n):
    B, N, Cin = x_flat.shape
    D = w.shape[1]
    return pl.pallas_call(
        _conv1x1_silu_kernel,
        out_shape=jax.ShapeDtypeStruct((B, N, D), jnp.bfloat16),
        grid=(B, N // tile_n),
        in_specs=[pl.BlockSpec((1, tile_n, Cin), lambda b, t: (b, t, 0)),
                  pl.BlockSpec((Cin, D), lambda b, t: (0, 0)),
                  pl.BlockSpec((1, D), lambda b, t: (0, 0))],
        out_specs=pl.BlockSpec((1, tile_n, D), lambda b, t: (b, t, 0)),
        compiler_params=_compiler_params(),
    )(x_flat, w, b)


def _call_fused(xs4, w1, b1, taps6, w2, b2, Ho, Wo, tile_h):
    _, B, _, Wp, Cin = xs4.shape[0], xs4.shape[1], xs4.shape[2], taps6.shape[3], xs4.shape[4]
    D = w1.shape[1]
    return pl.pallas_call(
        _downsample_fused_kernel,
        out_shape=jax.ShapeDtypeStruct((B, Ho, Wo, 2 * D), jnp.float32),
        grid=(B, Ho // tile_h),
        in_specs=[pl.BlockSpec((4, 1, tile_h, Wo, Cin), lambda b, t: (0, b, t, 0, 0)),
                  pl.BlockSpec((Cin, D), lambda b, t: (0, 0)),
                  pl.BlockSpec((1, D), lambda b, t: (0, 0)),
                  pl.BlockSpec((6, 1, tile_h, Wp, D), lambda b, t: (0, b, t, 0, 0)),
                  pl.BlockSpec((9, D, D), lambda b, t: (0, 0, 0)),
                  pl.BlockSpec((1, D), lambda b, t: (0, 0))],
        out_specs=pl.BlockSpec((1, tile_h, Wo, 2 * D), lambda b, t: (b, t, 0, 0)),
        compiler_params=_compiler_params(),
    )(xs4, w1, b1, taps6, w2, b2)


# ----------------------------- parameters & BN fold ---------------------------------

def init_params(key, in_dim):
    inter = in_dim // 2
    ks = jax.random.split(key, 6)

    def bn(k, c):
        k1, k2, k3, k4 = jax.random.split(k, 4)
        return dict(gamma=jax.random.uniform(k1, (c,), minval=0.7, maxval=1.3),
                    beta=jax.random.normal(k2, (c,)) * 0.1,
                    mean=jax.random.normal(k3, (c,)) * 0.1,
                    var=jax.random.uniform(k4, (c,), minval=0.5, maxval=1.5))

    return dict(
        conv1=dict(w=jax.random.normal(ks[0], (inter, in_dim, 1, 1)) * 0.3, **bn(ks[1], inter)),
        conv2a=dict(w=jax.random.normal(ks[2], (inter, in_dim, 1, 1)) * 0.3, **bn(ks[3], inter)),
        conv2b=dict(w=jax.random.normal(ks[4], (inter, inter, 3, 3)) * 0.3, **bn(ks[5], inter)),
    )


def fold_bn(w, gamma, beta, mean, var):
    """Fold BatchNorm (inference) into a bias-free conv: returns fused (OIHW weight, bias)."""
    scale = gamma / jnp.sqrt(var + _BN_EPS)
    return w * scale[:, None, None, None], beta - mean * scale


def _pick_tile(total, target):
    """Largest divisor of `total` that is <= target, preferring multiples of 8."""
    target = max(1, min(total, target))
    divs = [d for d in range(1, total + 1) if total % d == 0 and d <= target]
    m8 = [d for d in divs if d % 8 == 0]
    return max(m8) if m8 else max(divs)


# ----------------------------- forward ----------------------------------------------

def downsample_forward(x_nchw, params, spatial_tile=_SPATIAL_TILE):
    B, C, H, W = x_nchw.shape
    D = C // 2
    Ho, Wo = H // 2, W // 2

    x = jnp.transpose(x_nchw, (0, 2, 3, 1)).astype(jnp.bfloat16)            # NHWC bf16

    # fold BN into convs; matmul-layout weights in bf16, biases in f32
    # (NOTE: for configs with D < 128, lane-padding D up to 128 would make the output
    #  stores lane-dense; real YOLOv7 channel counts already satisfy this.)
    w1, b1 = fold_bn(**params['conv1'])
    w2a, b2a = fold_bn(**params['conv2a'])
    w2b, b2b = fold_bn(**params['conv2b'])
    w1m = w1[:, :, 0, 0].T.astype(jnp.bfloat16)                             # [C, D]
    w2am = w2a[:, :, 0, 0].T.astype(jnp.bfloat16)                           # [C, D]
    w2bm = jnp.transpose(w2b, (2, 3, 1, 0)).reshape(9, D, D).astype(jnp.bfloat16)
    b1m = b1.reshape(1, D).astype(jnp.float32)
    b2am = b2a.reshape(1, D).astype(jnp.float32)
    b2bm = b2b.reshape(1, D).astype(jnp.float32)

    # ---- branch 2a: 1x1 conv + BN + SiLU at full resolution (spatially tiled) ----
    tile_n = _pick_tile(H * W, spatial_tile)
    y = _call_conv1x1(x.reshape(B, H * W, C), w2am, b2am, tile_n).reshape(B, H, W, D)

    # row tile for the fused kernel (both branches share the output spatial grid)
    tile_h = _pick_tile(Ho, max(1, spatial_tile // Wo))

    # branch 1 input: 2x2 pool windows window-major -> elementwise maxima in-kernel
    xs4 = jnp.stack([x[:, dh::2, dw::2, :] for dh in (0, 1) for dw in (0, 1)], axis=0)
    # [4, B, Ho, Wo, C]

    # branch 2b input: pad y once and split into 6 (row-tap kh, col-parity) planes;
    # the nine 3x3/s2 taps become unit-stride slices inside the kernel (no 9x im2col).
    yp = jnp.pad(y, ((0, 0), (1, 1), (1, 1), (0, 0)))
    taps6 = jnp.stack([yp[:, kh:kh + H:2, p::2, :] for kh in range(3) for p in range(2)],
                      axis=0)                                               # [6, B, Ho, Wo+1, D]

    out = _call_fused(xs4, w1m, b1m, taps6, w2bm, b2bm, Ho, Wo, tile_h)     # [B, Ho, Wo, 2D]
    return jnp.transpose(out, (0, 3, 1, 2))                                 # NCHW


# ----------------------------- pure-JAX reference (for verification) ----------------

def reference_forward(x, params):
    def conv_bn_silu(inp, p, stride, pad):
        y = lax.conv_general_dilated(inp, p['w'], (stride, stride),
                                     [(pad, pad), (pad, pad)],
                                     dimension_numbers=('NCHW', 'OIHW', 'NCHW'))
        scale = p['gamma'] / jnp.sqrt(p['var'] + _BN_EPS)
        bias = p['beta'] - p['mean'] * scale
        y = y * scale[None, :, None, None] + bias[None, :, None, None]
        return y * (1.0 / (1.0 + jnp.exp(-y)))

    mp = lax.reduce_window(x, -jnp.inf, lax.max, (1, 1, 2, 2), (1, 1, 2, 2), 'VALID')
    x1 = conv_bn_silu(mp, params['conv1'], 1, 0)
    x2 = conv_bn_silu(x, params['conv2a'], 1, 0)
    x2 = conv_bn_silu(x2, params['conv2b'], 2, 1)
    return jnp.concatenate([x1, x2], axis=1)


if __name__ == "__main__":
    key = jax.random.PRNGKey(0)
    kx, kp = jax.random.split(key)
    B, C, H, W = 2, 4, 16, 16                       # in_dim=4 -> inter_dim=2
    x = jax.random.normal(kx, (B, C, H, W), dtype=jnp.float32)
    params = init_params(kp, C)

    out = downsample_forward(x, params)
    out = jax.block_until_ready(out)
    assert out.shape == (B, C, H // 2, W // 2), out.shape

    ref = reference_forward(x, params)
    # bf16 matmuls + approx-reciprocal SiLU: loosened tolerance vs the f32 reference.
    err = float(jnp.max(jnp.abs(out - ref)))
    assert jnp.allclose(out, ref, atol=3e-2, rtol=3e-2), err
    print("KERNEL_OK")
</pallas_src>

<mosaic_0001>
module attributes {stable_mosaic.version = 11 : i64} {
  func.func @_conv1x1_silu_kernel(%arg0: i32, %arg1: i32, %arg2: memref<1x256x4xbf16, #tpu.memory_space<vmem>>, %arg3: memref<4x2xbf16, #tpu.memory_space<vmem>>, %arg4: memref<1x2xf32, #tpu.memory_space<vmem>>, %arg5: memref<1x256x2xbf16, #tpu.memory_space<vmem>>) attributes {dimension_semantics = [#tpu.dimension_semantics<parallel>, #tpu.dimension_semantics<parallel>], iteration_bounds = array<i64: 2, 1>, scalar_prefetch = 0 : i64, scratch_operands = 0 : i64, tpu.core_type = #tpu.core_type<tc>, window_params = [{transform_indices = @transform_0, window_bounds = array<i64: 1, 256, 4>}, {pipeline_mode = #tpu.pipeline_mode<synchronous>, transform_indices = @transform_1, window_bounds = array<i64: 4, 2>}, {pipeline_mode = #tpu.pipeline_mode<synchronous>, transform_indices = @transform_2, window_bounds = array<i64: 1, 2>}, {transform_indices = @transform_3, window_bounds = array<i64: 1, 256, 2>}]} {
    %c0 = arith.constant 0 : index
    %c0_0 = arith.constant 0 : index
    %c0_1 = arith.constant 0 : index
    %0 = vector.load %arg2[%c0, %c0_0, %c0_1] : memref<1x256x4xbf16, #tpu.memory_space<vmem>>, vector<1x256x4xbf16>
    %1 = vector.shape_cast %0 : vector<1x256x4xbf16> to vector<256x4xbf16>
    %c0_2 = arith.constant 0 : index
    %c0_3 = arith.constant 0 : index
    %2 = vector.load %arg3[%c0_2, %c0_3] : memref<4x2xbf16, #tpu.memory_space<vmem>>, vector<4x2xbf16>
    %cst = arith.constant dense<0.000000e+00> : vector<256x2xf32>
    %3 = tpu.matmul %1, %2, %cst {dimension_numbers = #tpu.dot_dimension_numbers<[1], [0], [0], [1], [0, 0, 1, 1], [], []>} : vector<256x4xbf16>, vector<4x2xbf16>, vector<256x2xf32> -> vector<256x2xf32>
    %c0_4 = arith.constant 0 : index
    %c0_5 = arith.constant 0 : index
    %4 = vector.load %arg4[%c0_4, %c0_5] : memref<1x2xf32, #tpu.memory_space<vmem>>, vector<1x2xf32>
    %5 = vector.broadcast %4 : vector<1x2xf32> to vector<256x2xf32>
    %6 = arith.addf %3, %5 : vector<256x2xf32>
    %cst_6 = arith.constant 0.000000e+00 : f32
    %7 = vector.broadcast %cst_6 : f32 to vector<256x2xf32>
    %8 = arith.subf %7, %6 : vector<256x2xf32>
    %9 = math.exp %8 : vector<256x2xf32>
    %cst_7 = arith.constant 1.000000e+00 : f32
    %10 = vector.broadcast %cst_7 : f32 to vector<256x2xf32>
    %11 = arith.addf %10, %9 : vector<256x2xf32>
    %12 = tpu.reciprocal %11 {approx = true} : vector<256x2xf32> -> vector<256x2xf32>
    %13 = arith.mulf %6, %12 : vector<256x2xf32>
    %14 = arith.truncf %13 : vector<256x2xf32> to vector<256x2xbf16>
    %c0_8 = arith.constant 0 : index
    %c0_9 = arith.constant 0 : index
    %c0_10 = arith.constant 0 : index
    %15 = vector.load %arg5[%c0_8, %c0_9, %c0_10] : memref<1x256x2xbf16, #tpu.memory_space<vmem>>, vector<1x256x2xbf16>
    %16 = vector.shape_cast %15 : vector<1x256x2xbf16> to vector<256x2xbf16>
    %17 = vector.shape_cast %14 : vector<256x2xbf16> to vector<1x256x2xbf16>
    tpu.vector_store %arg5[%c0_8, %c0_9, %c0_10], %17 {strides = array<i32>} : memref<1x256x2xbf16, #tpu.memory_space<vmem>>, vector<1x256x2xbf16>,
    return
  }
  func.func @transform_0(%arg0: i32, %arg1: i32) -> (i32, i32, i32) {
    %c0_i32 = arith.constant 0 : i32
    %c0_i32_0 = arith.constant 0 : i32
    return %arg0, %arg1, %c0_i32 : i32, i32, i32
  }
  func.func @transform_1(%arg0: i32, %arg1: i32) -> (i32, i32) {
    %c0_i32 = arith.constant 0 : i32
    %c0_i32_0 = arith.constant 0 : i32
    %c0_i32_1 = arith.constant 0 : i32
    return %c0_i32, %c0_i32_0 : i32, i32
  }
  func.func @transform_2(%arg0: i32, %arg1: i32) -> (i32, i32) {
    %c0_i32 = arith.constant 0 : i32
    %c0_i32_0 = arith.constant 0 : i32
    %c0_i32_1 = arith.constant 0 : i32
    return %c0_i32, %c0_i32_0 : i32, i32
  }
  func.func @transform_3(%arg0: i32, %arg1: i32) -> (i32, i32, i32) {
    %c0_i32 = arith.constant 0 : i32
    %c0_i32_0 = arith.constant 0 : i32
    return %arg0, %arg1, %c0_i32 : i32, i32, i32
  }
}

</mosaic_0001>

<bundles_post_ra>
// kernel: tpu_custom_call.1
= control target key start
LH: loop header
LB: loop body
LE: loop exit
PB: predicated region body
PF: predicated region fallthrough
CT: control target
= control target key end

     0   :  { %s1362_s12 = smov 0   ;;  %s1364_s13 = smov 0   ;;  %s1697_s0 = inlined_call_operand.vmem [shape: bf16[2,256,4], index: 0, kind: input, shape index: {}]   ;;  %s1698_s1 = inlined_call_operand.vmem [shape: bf16[4,2], index: 1, kind: input, shape index: {}]   ;;  %s1699_s2 = inlined_call_operand.vmem [shape: f32[1,2], index: 2, kind: input, shape index: {}]   ;;  %s1700_s3 = inlined_call_operand.vmem [shape: bf16[2,256,2], index: 3, kind: output, shape index: {}]  }
   0x1   :  { %s1366_s14 = smov 0  }
   0x2 LB: > { %s25_s15 = sadd.s32 1, %s1336_s13  ;;  %p989_p0 = scmp.ge.s32.totalorder %s1340_s14, 1  ;;  %s1340_s14 = sphi %s1366_s14, %s13_s14   ;;  %s1336_s13 = sphi %s1364_s13, %s1702_s13   ;;  %s1332_s12 = sphi %s1362_s12, %s1701_s12  }
   0x3   : > { %p27_p1 = scmp.ge.s32.totalorder %s25_s15, 2  ;;  %p158_p2 = scmp.lt.s32.totalorder %s1340_s14, 3 }
   0x5   : > { %s1704_s15 = smov (%p27_p1, %s25_s15), 0  ;;  %p159_p3 = pnand %p989_p0, %p158_p2 }
   0x6   : > { %v243_v0 = vld [vmem:[%s1698_s1] sm:$0x3] (!%p159_p3)  ;;  %vm380_vm0 = vcmask (!%p159_p3), 1041408   ;;  %p191_p4 = scmp.lt.s32.totalorder (!%p159_p3), %s1332_s12, 1  ;;  %vm331_vm1 = vcmask (!%p159_p3), 31744   ;;  %vm865_vm2 = vcmask (!%p159_p3), 11264  }
   0x7   : > { %162 = sbr.rel (%p159_p3) target bundleno = 325 (0x145), region = 32  ;;  %1148 = vmatprep.subr.msk.bf16.mxu0 (!%p159_p3), %vm380_vm0, %v243_v0  ;;  %1149 = vmatprep.subr.msk.bf16.mxu1 (!%p159_p3), %vm380_vm0, %v243_v0  ;;  %v382_v1 = vsel (!%p159_p3), %vm380_vm0, %v243_v0, 0  ;;  %v1428_v18 = vld [vmem:[%s1699_s2] ss:$0 sm:$0xff] (!%p159_p3) }
   0x8   : > { %1113 = vmatpush3.bf16.msra.mxu0 (!%p159_p3), %v382_v1  ;;  %1147 = vmatpush3.bf16.msra.mxu1 (!%p159_p3), %v382_v1 }
   0xe   : > { %s1706_s12 = smov (!%p191_p4, %s1332_s12), 1 }
   0xf   : > { %s1061_s18 = sshll.u32 %s1706_s12, 7 }
  0x10   : > { %s1391_s21 = scalar_lea.vmem %s1697_s0, %s1061_s18  ;;  %s1550_s26 = scalar_lea.vmem %s1700_s3, %s1061_s18 }
  0x11   : > { %v1174_v2 = vld [vmem:[%s1391_s21] sm:$0xff]   ;;  %v1176_v4 = vld [vmem:[%s1391_s21 + $0x8] sm:$0xff]   ;;  %v1178_v6 = vld [vmem:[%s1391_s21 + $0x10] sm:$0xff]  }
  0x12   : > { %v1175_v3 = vld [vmem:[%s1391_s21 + $0x40] sm:$0xff]   ;;  %1114 = vmatprep.mubr.msk.bf16.mxu0 %vm331_vm1, %v1174_v2  ;;  %v1177_v5 = vld [vmem:[%s1391_s21 + $0x48] sm:$0xff]   ;;  %v1179_v7 = vld [vmem:[%s1391_s21 + $0x50] sm:$0xff]  }
  0x13   : > { %1130 = vmatprep.mubr.msk.bf16.mxu1 %vm331_vm1, %v1175_v3  ;;  %1115 = vmatmul.mubr.msk.bf16.vlgmr.msra.gmra.mrb[0].mxu0 %vm331_vm1, %v1176_v4  ;;  %v1180_v8 = vld [vmem:[%s1391_s21 + $0x18] sm:$0xff]   ;;  %v1182_v10 = vld [vmem:[%s1391_s21 + $0x20] sm:$0xff]   ;;  %v1184_v12 = vld [vmem:[%s1391_s21 + $0x28] sm:$0xff]  }
  0x14   : > { %1131 = vmatmul.mubr.msk.bf16.vlgmr.msra.gmra.mrb[0].mxu1 %vm331_vm1, %v1177_v5  ;;  %1118 = vmatprep.mubr.msk.bf16.mxu0 %vm331_vm1, %v1178_v6  ;;  %v1181_v9 = vld [vmem:[%s1391_s21 + $0x58] sm:$0xff]   ;;  %v1183_v11 = vld [vmem:[%s1391_s21 + $0x60] sm:$0xff]   ;;  %v1185_v13 = vld [vmem:[%s1391_s21 + $0x68] sm:$0xff]  }
  0x15   : > { %1134 = vmatprep.mubr.msk.bf16.mxu1 %vm331_vm1, %v1179_v7  ;;  %v1186_v14 = vld [vmem:[%s1391_s21 + $0x30] sm:$0xff]   ;;  %v1188_v16 = vld [vmem:[%s1391_s21 + $0x38] sm:$0xff]  }
  0x16   : > { %v1187_v15 = vld [vmem:[%s1391_s21 + $0x70] sm:$0xff]   ;;  %v1189_v17 = vld [vmem:[%s1391_s21 + $0x78] sm:$0xff]  }
  0x1b   : > { %1119 = vmatmul.mubr.msk.bf16.gmra.mrb[4].mxu0 %vm331_vm1, %v1180_v8 }
  0x1c   : > { %1135 = vmatmul.mubr.msk.bf16.gmra.mrb[4].mxu1 %vm331_vm1, %v1181_v9  ;;  %1122 = vmatprep.mubr.msk.bf16.mxu0 %vm331_vm1, %v1182_v10 }
  0x1d   : > { %1138 = vmatprep.mubr.msk.bf16.mxu1 %vm331_vm1, %v1183_v11 }
  0x23   : > { %1123 = vmatmul.mubr.msk.bf16.gmra.mrb[8].mxu0 %vm331_vm1, %v1184_v12 }
  0x24   : > { %1139 = vmatmul.mubr.msk.bf16.gmra.mrb[8].mxu1 %vm331_vm1, %v1185_v13  ;;  %1126 = vmatprep.mubr.msk.bf16.mxu0 %vm331_vm1, %v1186_v14 }
  0x25   : > { %1142 = vmatprep.mubr.msk.bf16.mxu1 %vm331_vm1, %v1187_v15 }
  0x2b   : > { %1127 = vmatmul.mubr.msk.bf16.gmra.mrb[12].mxu0 %vm331_vm1, %v1188_v16 }
  0x2c   : > { %1143 = vmatmul.mubr.msk.bf16.gmra.mrb[12].mxu1 %vm331_vm1, %v1189_v17 }
  0xe6   : > { %v1116_v19 = vpop.f32.mrb[0].mxu0 }
  0xe7   : > { %v1431_v20 = vadd.f32 %v1116_v19, %v1428_v18  ;;  %v1132_v21 = vpop.f32.mrb[0].mxu1  ;;  %v418_v22 = vpop.f32.mrb[1].mxu0 }
  0xe8   : > { %v1434_v23 = vadd.f32 %v1132_v21, %v1428_v18  ;;  %v1437_v24 = vadd.f32 %v1428_v18, %v418_v22  ;;  %v482_v25 = vpop.f32.mrb[1].mxu1  ;;  %v1117_v26 = vpop.f32.mrb[2].mxu0 }
  0xe9   : > { %v547_v27 = vsub.f32 0.0, %v1431_v20  ;;  %v1441_v28 = vadd.f32 %v1428_v18, %v482_v25  ;;  %v1444_v29 = vadd.f32 %v1117_v26, %v1428_v18  ;;  %v1133_v30 = vpop.f32.mrb[2].mxu1  ;;  %v421_v31 = vpop.f32.mrb[3].mxu0 }
  0xea   : > { %v563_v32 = vsub.f32 0.0, %v1434_v23  ;;  %v545_v33 = vsub.f32 0.0, %v1437_v24  ;;  %v1449_v34 = vadd.f32 %v1133_v30, %v1428_v18  ;;  %v1452_v35 = vadd.f32 %v1428_v18, %v421_v31  ;;  %v485_v36 = vpop.f32.mrb[3].mxu1 }
  0xeb   : > { %v581_v37 = vmul.f32 1.442695, %v547_v27  ;;  %v561_v38 = vsub.f32 0.0, %v1441_v28  ;;  %v548_v39 = vsub.f32 0.0, %v1444_v29  ;;  %v1457_v40 = vadd.f32 %v1428_v18, %v485_v36 }
  0xec   : > { %v613_v41 = vmul.f32 1.442695, %v563_v32  ;;  %v577_v42 = vmul.f32 1.442695, %v545_v33  ;;  %v564_v43 = vsub.f32 0.0, %v1449_v34  ;;  %v546_v44 = vsub.f32 0.0, %v1452_v35 }
  0xed   : > { %1190 = vpow2.f32 %v581_v37  ;;  %v609_v45 = vmul.f32 1.442695, %v561_v38  ;;  %v583_v46 = vmul.f32 1.442695, %v548_v39  ;;  %v562_v47 = vsub.f32 0.0, %v1457_v40 }
  0xee   : > { %1192 = vpow2.f32 %v613_v41  ;;  %v615_v48 = vmul.f32 1.442695, %v564_v43  ;;  %v1120_v49 = vpop.f32.mrb[4].mxu0  ;;  %v579_v50 = vmul.f32 1.442695, %v546_v44 }
  0xef   : > { %1194 = vpow2.f32 %v577_v42  ;;  %v1463_v51 = vadd.f32 %v1120_v49, %v1428_v18  ;;  %v1136_v52 = vpop.f32.mrb[4].mxu1  ;;  %v434_v53 = vpop.f32.mrb[5].mxu0  ;;  %v611_v54 = vmul.f32 1.442695, %v562_v47 }
  0xf0   : > { %1196 = vpow2.f32 %v609_v45  ;;  %v1466_v55 = vadd.f32 %v1136_v52, %v1428_v18  ;;  %v1469_v56 = vadd.f32 %v1428_v18, %v434_v53  ;;  %v498_v57 = vpop.f32.mrb[5].mxu1  ;;  %v1121_v58 = vpop.f32.mrb[6].mxu0 }
  0xf1   : > { %1198 = vpow2.f32 %v583_v46  ;;  %v551_v59 = vsub.f32 0.0, %v1463_v51  ;;  %v1473_v60 = vadd.f32 %v1428_v18, %v498_v57  ;;  %v1476_v61 = vadd.f32 %v1121_v58, %v1428_v18  ;;  %v1137_v62 = vpop.f32.mrb[6].mxu1  ;;  %v437_v63 = vpop.f32.mrb[7].mxu0 }
  0xf2   : > { %1200 = vpow2.f32 %v615_v48  ;;  %v567_v0 = vsub.f32 0.0, %v1466_v55  ;;  %v549_v1 = vsub.f32 0.0, %v1469_v56  ;;  %v1481_v2 = vadd.f32 %v1137_v62, %v1428_v18  ;;  %v501_v3 = vpop.f32.mrb[7].mxu1 }
  0xf3   : > { %1202 = vpow2.f32 %v579_v50  ;;  %v589_v4 = vmul.f32 1.442695, %v551_v59  ;;  %v565_v5 = vsub.f32 0.0, %v1473_v60  ;;  %v552_v6 = vsub.f32 0.0, %v1476_v61 }
  0xf4   : > { %1204 = vpow2.f32 %v611_v54  ;;  %v621_v7 = vmul.f32 1.442695, %v567_v0  ;;  %v585_v8 = vmul.f32 1.442695, %v549_v1  ;;  %v568_v11 = vsub.f32 0.0, %v1481_v2 }
  0xf5   : > { %1206 = vpow2.f32 %v589_v4  ;;  %v617_v9 = vmul.f32 1.442695, %v565_v5  ;;  %v591_v10 = vmul.f32 1.442695, %v552_v6  ;;  %v1487_v19 = vadd.f32 %v1428_v18, %v437_v63 }
  0xf6   : > { %1208 = vpow2.f32 %v621_v7  ;;  %v1124_v12 = vpop.f32.mrb[8].mxu0  ;;  %v1490_v27 = vadd.f32 %v1428_v18, %v501_v3  ;;  %v1494_v36 = vmul.f32 1.442695, %v568_v11 }
  0xf7   : > { %v1191_v13 = vpop.eup %1190  ;;  %1210 = vpow2.f32 %v585_v8  ;;  %v1140_v14 = vpop.f32.mrb[8].mxu1  ;;  %v1497_v37 = vadd.f32 %v1124_v12, %v1428_v18  ;;  %v550_v46 = vsub.f32 0.0, %v1487_v19 }
  0xf8   : > { %v450_v15 = vpop.f32.mrb[9].mxu0  ;;  %v1193_v16 = vpop.eup %1192  ;;  %v643_v17 = vadd.f32 1.0, %v1191_v13  ;;  %1212 = vpow2.f32 %v617_v9  ;;  %v1502_v42 = vadd.f32 %v1140_v14, %v1428_v18  ;;  %v566_v50 = vsub.f32 0.0, %v1490_v27 }
  0xf9   : > { %v514_v21 = vpop.f32.mrb[9].mxu1  ;;  %v1125_v22 = vpop.f32.mrb[10].mxu0  ;;  %v659_v26 = vadd.f32 1.0, %v1193_v16  ;;  %1214 = vpow2.f32 %v591_v10  ;;  %v1505_v43 = vadd.f32 %v1428_v18, %v450_v15  ;;  %v555_v57 = vsub.f32 0.0, %v1497_v37 }
  0xfa   : > { %v1195_v25 = vpop.eup %1194  ;;  %v1141_v30 = vpop.f32.mrb[10].mxu1  ;;  %1216 = vrcp.f32 %v643_v17  ;;  %v1509_v47 = vadd.f32 %v1428_v18, %v514_v21  ;;  %v1513_v52 = vadd.f32 %v1125_v22, %v1428_v18  ;;  %v571_v0 = vsub.f32 0.0, %v1502_v42 }
  0xfb   : > { %v1492_v31 = vpop.f32.mrb[11].mxu0  ;;  %v1197_v32 = vpop.eup %1196  ;;  %v641_v33 = vadd.f32 1.0, %v1195_v25  ;;  %1218 = vrcp.f32 %v659_v26  ;;  %v1517_v58 = vadd.f32 %v1141_v30, %v1428_v18  ;;  %v553_v1 = vsub.f32 0.0, %v1505_v43 }
  0xfc   : > { %v1499_v38 = vpop.f32.mrb[11].mxu1  ;;  %v1199_v39 = vpop.eup %1198  ;;  %v657_v41 = vadd.f32 1.0, %v1197_v32  ;;  %v587_v7 = vmul.f32 1.442695, %v550_v46  ;;  %v569_v8 = vsub.f32 0.0, %v1509_v47  ;;  %v556_v14 = vsub.f32 0.0, %v1513_v52 }
  0xfd   : > { %v1201_v44 = vpop.eup %1200  ;;  %1220 = vrcp.f32 %v641_v33  ;;  %v644_v45 = vadd.f32 1.0, %v1199_v39  ;;  %v619_v13 = vmul.f32 1.442695, %v566_v50  ;;  %v597_v22 = vmul.f32 1.442695, %v555_v57 }
  0xfe   : > { %v1203_v48 = vpop.eup %1202  ;;  %1222 = vrcp.f32 %v657_v41  ;;  %v660_v49 = vadd.f32 1.0, %v1201_v44  ;;  %v1128_v59 = vpop.f32.mrb[12].mxu0  ;;  %v572_v25 = vsub.f32 0.0, %v1517_v58  ;;  %v629_v33 = vmul.f32 1.442695, %v571_v0 }
  0xff   : > { %v1205_v53 = vpop.eup %1204  ;;  %1224 = vrcp.f32 %v644_v45  ;;  %v642_v54 = vadd.f32 1.0, %v1203_v48  ;;  %v1144_v3 = vpop.f32.mrb[12].mxu1  ;;  %v593_v39 = vmul.f32 1.442695, %v553_v1  ;;  %v625_v45 = vmul.f32 1.442695, %v569_v8 }
 0x100   : > { %v1207_v62 = vpop.eup %1206  ;;  %1226 = vrcp.f32 %v660_v49  ;;  %v658_v63 = vadd.f32 1.0, %v1205_v53  ;;  %v1521_v4 = vpop.f32.mrb[13].mxu0  ;;  %v1538_v46 = vadd.f32 %v1428_v18, %v1492_v31  ;;  %v599_v50 = vmul.f32 1.442695, %v556_v14 }
 0x101   : > { %v1209_v5 = vpop.eup %1208  ;;  %1228 = vrcp.f32 %v642_v54  ;;  %v647_v6 = vadd.f32 1.0, %v1207_v62  ;;  %v1524_v9 = vpop.f32.mrb[13].mxu1  ;;  %v1543_v53 = vadd.f32 %v1428_v18, %v1499_v38  ;;  %v631_v57 = vmul.f32 1.442695, %v572_v25 }
 0x102   : > { %v1526_v10 = vpop.f32.mrb[14].mxu0  ;;  %v1211_v11 = vpop.eup %1210  ;;  %1230 = vrcp.f32 %v658_v63  ;;  %v663_v12 = vadd.f32 1.0, %v1209_v5  ;;  %v1559_v0 = vadd.f32 %v1144_v3, %v1428_v18 }
 0x103   : > { %v1529_v15 = vpop.f32.mrb[14].mxu1  ;;  %v1531_v16 = vpop.f32.mrb[15].mxu0  ;;  %1232 = vrcp.f32 %v647_v6  ;;  %v645_v21 = vadd.f32 1.0, %v1211_v11 }
 0x104   : > { %v1213_v17 = vpop.eup %1212  ;;  %v1534_v26 = vpop.f32.mrb[15].mxu1  ;;  %1234 = vrcp.f32 %v663_v12 }
 0x105   : > { %v1215_v30 = vpop.eup %1214  ;;  %v661_v32 = vadd.f32 1.0, %v1213_v17  ;;  %1236 = vrcp.f32 %v645_v21 }
 0x106   : > { %v1217_v41 = vpop.eup %1216  ;;  %v648_v44 = vadd.f32 1.0, %v1215_v30 }
 0x107   : > { %v1219_v48 = vpop.eup %1218  ;;  %v707_v49 = vmul.f32 %v1217_v41, %v1431_v20  ;;  %1238 = vrcp.f32 %v661_v32  ;;  %v1554_v20 = vadd.f32 %v1128_v59, %v1428_v18 }
 0x108   : > { %v1221_v54 = vpop.eup %1220  ;;  %v723_v31 = vmul.f32 %v1219_v48, %v1434_v23  ;;  %1240 = vrcp.f32 %v648_v44  ;;  %v554_v23 = vsub.f32 0.0, %v1538_v46 }
 0x109   : > { %v1223_v62 = vpop.eup %1222  ;;  %v1065_v63 = vpack.c.bf16 %v707_v49, %v707_v49  ;;  %v705_v38 = vmul.f32 %v1221_v54, %v1437_v24  ;;  %1242 = vpow2.f32 %v1494_v36  ;;  %v570_v24 = vsub.f32 0.0, %v1543_v53 }
 0x10a   : > { %v1225_v1 = vpop.eup %1224  ;;  %v1081_v5 = vpack.c.bf16 %v723_v31, %v723_v31  ;;  %v721_v6 = vmul.f32 %v1223_v62, %v1441_v28  ;;  %1244 = vpow2.f32 %v587_v7  ;;  %v559_v7 = vsub.f32 0.0, %v1554_v20 }
 0x10b   : > { %v1227_v59 = vpop.eup %1226  ;;  %868 = vst.msk [vmem:[%s1550_s26 + $0x8] sm:$0xf] %vm865_vm2, %v1065_v63  ;;  %v1063_v8 = vpack.c.bf16 %v705_v38, %v705_v38  ;;  %v708_v11 = vmul.f32 %v1225_v1, %v1444_v29  ;;  %1246 = vpow2.f32 %v619_v13  ;;  %v575_v13 = vsub.f32 0.0, %v1559_v0 }
 0x10c   : > { %v1229_v36 = vpop.eup %1228  ;;  %884 = vst.msk [vmem:[%s1550_s26 + $0x48] sm:$0xf] %vm865_vm2, %v1081_v5  ;;  %v1079_v3 = vpack.c.bf16 %v721_v6, %v721_v6  ;;  %v724_v28 = vmul.f32 %v1227_v59, %v1449_v34  ;;  %1248 = vpow2.f32 %v597_v22  ;;  %v595_v22 = vmul.f32 1.442695, %v554_v23 }
 0x10d   : > { %v1231_v12 = vpop.eup %1230  ;;  %866 = vst.msk [vmem:[%s1550_s26] sm:$0xf] %vm865_vm2, %v1063_v8  ;;  %v1066_v14 = vpack.c.bf16 %v708_v11, %v708_v11  ;;  %v706_v29 = vmul.f32 %v1229_v36, %v1452_v35  ;;  %1250 = vpow2.f32 %v629_v33  ;;  %v627_v35 = vmul.f32 1.442695, %v570_v24 }
 0x10e   : > { %v1233_v17 = vpop.eup %1232  ;;  %882 = vst.msk [vmem:[%s1550_s26 + $0x40] sm:$0xf] %vm865_vm2, %v1079_v3  ;;  %v1082_v21 = vpack.c.bf16 %v724_v28, %v724_v28  ;;  %v722_v34 = vmul.f32 %v1231_v12, %v1457_v40  ;;  %1252 = vpow2.f32 %v593_v39  ;;  %v605_v40 = vmul.f32 1.442695, %v559_v7 }
 0x10f   : > { %v1235_v25 = vpop.eup %1234  ;;  %869 = vst.msk [vmem:[%s1550_s26 + $0xc] sm:$0xf] %vm865_vm2, %v1066_v14  ;;  %v1064_v30 = vpack.c.bf16 %v706_v29, %v706_v29  ;;  %v711_v32 = vmul.f32 %v1233_v17, %v1463_v51  ;;  %1254 = vpow2.f32 %v625_v45  ;;  %v637_v51 = vmul.f32 1.442695, %v575_v13 }
 0x110   : > { %v1237_v33 = vpop.eup %1236  ;;  %885 = vst.msk [vmem:[%s1550_s26 + $0x4c] sm:$0xf] %vm865_vm2, %v1082_v21  ;;  %v1080_v41 = vpack.c.bf16 %v722_v34, %v722_v34  ;;  %v727_v44 = vmul.f32 %v1235_v25, %v1466_v55  ;;  %1256 = vpow2.f32 %v599_v50  ;;  %v1603_v59 = vadd.f32 %v1428_v18, %v1521_v4 }
 0x111   : > { %v1239_v39 = vpop.eup %1238  ;;  %867 = vst.msk [vmem:[%s1550_s26 + $0x4] sm:$0xf] %vm865_vm2, %v1064_v30  ;;  %v1069_v48 = vpack.c.bf16 %v711_v32, %v711_v32  ;;  %v709_v49 = vmul.f32 %v1237_v33, %v1469_v56  ;;  %1258 = vpow2.f32 %v631_v57  ;;  %v1607_v24 = vadd.f32 %v1428_v18, %v1524_v9 }
 0x112   : > { %v1241_v45 = vpop.eup %1240  ;;  %883 = vst.msk [vmem:[%s1550_s26 + $0x44] sm:$0xf] %vm865_vm2, %v1080_v41  ;;  %v1085_v54 = vpack.c.bf16 %v727_v44, %v727_v44  ;;  %v725_v31 = vmul.f32 %v1239_v39, %v1473_v60  ;;  %1260 = vpow2.f32 %v595_v22  ;;  %v1611_v28 = vadd.f32 %v1526_v10, %v1428_v18 }
 0x113   : > { %v1243_v55 = vpop.eup %1242  ;;  %872 = vst.msk [vmem:[%s1550_s26 + $0x18] sm:$0xf] %vm865_vm2, %v1069_v48  ;;  %v1067_v50 = vpack.c.bf16 %v709_v49, %v709_v49  ;;  %v712_v62 = vmul.f32 %v1241_v45, %v1476_v61  ;;  %1262 = vpow2.f32 %v627_v35  ;;  %v1615_v4 = vadd.f32 %v1529_v15, %v1428_v18 }
 0x114   : > { %v1245_v56 = vpop.eup %1244  ;;  %888 = vst.msk [vmem:[%s1550_s26 + $0x58] sm:$0xf] %vm865_vm2, %v1085_v54  ;;  %v1083_v57 = vpack.c.bf16 %v725_v31, %v725_v31  ;;  %v664_v63 = vadd.f32 1.0, %v1243_v55  ;;  %1264 = vpow2.f32 %v605_v40  ;;  %v557_v9 = vsub.f32 0.0, %v1603_v59 }
 0x115   : > { %v1247_v38 = vpop.eup %1246  ;;  %870 = vst.msk [vmem:[%s1550_s26 + $0x10] sm:$0xf] %vm865_vm2, %v1067_v50  ;;  %v1070_v60 = vpack.c.bf16 %v712_v62, %v712_v62  ;;  %v646_v1 = vadd.f32 1.0, %v1245_v56  ;;  %1266 = vpow2.f32 %v637_v51  ;;  %v1620_v13 = vadd.f32 %v1428_v18, %v1531_v16 }
 0x116   : > { %v1249_v5 = vpop.eup %1248  ;;  %886 = vst.msk [vmem:[%s1550_s26 + $0x50] sm:$0xf] %vm865_vm2, %v1083_v57  ;;  %1268 = vrcp.f32 %v664_v63  ;;  %v662_v6 = vadd.f32 1.0, %v1247_v38  ;;  %v573_v21 = vsub.f32 0.0, %v1607_v24  ;;  %v1625_v34 = vadd.f32 %v1428_v18, %v1534_v26 }
 0x117   : > { %v1251_v61 = vpop.eup %1250  ;;  %873 = vst.msk [vmem:[%s1550_s26 + $0x1c] sm:$0xf] %vm865_vm2, %v1070_v60  ;;  %1270 = vrcp.f32 %v646_v1  ;;  %v651_v23 = vadd.f32 1.0, %v1249_v5  ;;  %v560_v25 = vsub.f32 0.0, %v1611_v28  ;;  %v576_v16 = vsub.f32 0.0, %v1615_v4 }
 0x118   : > { %v1253_v8 = vpop.eup %1252  ;;  %1272 = vrcp.f32 %v662_v6  ;;  %v667_v11 = vadd.f32 1.0, %v1251_v61  ;;  %v601_v41 = vmul.f32 1.442695, %v557_v9  ;;  %v558_v44 = vsub.f32 0.0, %v1620_v13 }
 0x119   : > { %v1255_v36 = vpop.eup %1254  ;;  %1274 = vrcp.f32 %v651_v23  ;;  %v649_v3 = vadd.f32 1.0, %v1253_v8  ;;  %v633_v26 = vmul.f32 1.442695, %v573_v21  ;;  %v574_v39 = vsub.f32 0.0, %v1625_v34 }
 0x11a   : > { %v1257_v7 = vpop.eup %1256  ;;  %1276 = vrcp.f32 %v667_v11  ;;  %v665_v12 = vadd.f32 1.0, %v1255_v36  ;;  %v607_v51 = vmul.f32 1.442695, %v560_v25  ;;  %v639_v31 = vmul.f32 1.442695, %v576_v16 }
 0x11b   : > { %v1259_v14 = vpop.eup %1258  ;;  %1278 = vrcp.f32 %v649_v3  ;;  %v652_v29 = vadd.f32 1.0, %v1257_v7  ;;  %v603_v56 = vmul.f32 1.442695, %v558_v44  ;;  %v635_v38 = vmul.f32 1.442695, %v574_v39 }
 0x11c   : > { %v1261_v17 = vpop.eup %1260  ;;  %1280 = vrcp.f32 %v665_v12  ;;  %v668_v10 = vadd.f32 1.0, %v1259_v14 }
 0x11d   : > { %v1263_v15 = vpop.eup %1262  ;;  %1282 = vrcp.f32 %v652_v29  ;;  %v650_v22 = vadd.f32 1.0, %v1261_v17 }
 0x11e   : > { %v1265_v30 = vpop.eup %1264  ;;  %1284 = vrcp.f32 %v668_v10  ;;  %v666_v32 = vadd.f32 1.0, %v1263_v15 }
 0x11f   : > { %v1267_v35 = vpop.eup %1266  ;;  %1286 = vrcp.f32 %v650_v22  ;;  %v655_v33 = vadd.f32 1.0, %v1265_v30 }
 0x120   : > { %v1269_v40 = vpop.eup %1268  ;;  %1288 = vrcp.f32 %v666_v32  ;;  %v671_v18 = vadd.f32 1.0, %v1267_v35 }
 0x121   : > { %v1271_v48 = vpop.eup %1270  ;;  %v728_v49 = vmul.f32 %v1269_v40, %v1481_v2  ;;  %1290 = vrcp.f32 %v655_v33 }
 0x122   : > { %v1273_v45 = vpop.eup %1272  ;;  %v710_v54 = vmul.f32 %v1271_v48, %v1487_v19  ;;  %1292 = vrcp.f32 %v671_v18 }
 0x123   : > { %v1275_v55 = vpop.eup %1274  ;;  %v1086_v50 = vpack.c.bf16 %v728_v49, %v728_v49  ;;  %v726_v62 = vmul.f32 %v1273_v45, %v1490_v27  ;;  %1294 = vpow2.f32 %v601_v41 }
 0x124   : > { %v1277_v57 = vpop.eup %1276  ;;  %v1068_v63 = vpack.c.bf16 %v710_v54, %v710_v54  ;;  %v715_v2 = vmul.f32 %v1275_v55, %v1497_v37  ;;  %1296 = vpow2.f32 %v633_v26 }
 0x125   : > { %v1279_v60 = vpop.eup %1278  ;;  %889 = vst.msk [vmem:[%s1550_s26 + $0x5c] sm:$0xf] %vm865_vm2, %v1086_v50  ;;  %v1084_v19 = vpack.c.bf16 %v726_v62, %v726_v62  ;;  %v731_v1 = vmul.f32 %v1277_v57, %v1502_v42  ;;  %1298 = vpow2.f32 %v607_v51 }
 0x126   : > { %v1281_v5 = vpop.eup %1280  ;;  %871 = vst.msk [vmem:[%s1550_s26 + $0x14] sm:$0xf] %vm865_vm2, %v1068_v63  ;;  %v1073_v27 = vpack.c.bf16 %v715_v2, %v715_v2  ;;  %v713_v6 = vmul.f32 %v1279_v60, %v1505_v43  ;;  %1300 = vpow2.f32 %v639_v31 }
 0x127   : > { %v1283_v37 = vpop.eup %1282  ;;  %887 = vst.msk [vmem:[%s1550_s26 + $0x54] sm:$0xf] %vm865_vm2, %v1084_v19  ;;  %v1089_v61 = vpack.c.bf16 %v731_v1, %v731_v1  ;;  %v729_v23 = vmul.f32 %v1281_v5, %v1509_v47  ;;  %1302 = vpow2.f32 %v603_v56 }
 0x128   : > { %v1285_v8 = vpop.eup %1284  ;;  %876 = vst.msk [vmem:[%s1550_s26 + $0x28] sm:$0xf] %vm865_vm2, %v1073_v27  ;;  %v1071_v42 = vpack.c.bf16 %v713_v6, %v713_v6  ;;  %v716_v11 = vmul.f32 %v1283_v37, %v1513_v52  ;;  %1304 = vpow2.f32 %v635_v38 }
 0x129   : > { %v1287_v36 = vpop.eup %1286  ;;  %892 = vst.msk [vmem:[%s1550_s26 + $0x68] sm:$0xf] %vm865_vm2, %v1089_v61  ;;  %v1087_v43 = vpack.c.bf16 %v729_v23, %v729_v23  ;;  %v732_v3 = vmul.f32 %v1285_v8, %v1517_v58 }
 0x12a   : > { %v1289_v7 = vpop.eup %1288  ;;  %874 = vst.msk [vmem:[%s1550_s26 + $0x20] sm:$0xf] %vm865_vm2, %v1071_v42  ;;  %v1074_v47 = vpack.c.bf16 %v716_v11, %v716_v11  ;;  %v714_v12 = vmul.f32 %v1287_v36, %v1538_v46 }
 0x12b   : > { %v1291_v14 = vpop.eup %1290  ;;  %890 = vst.msk [vmem:[%s1550_s26 + $0x60] sm:$0xf] %vm865_vm2, %v1087_v43  ;;  %v1090_v52 = vpack.c.bf16 %v732_v3, %v732_v3  ;;  %v730_v29 = vmul.f32 %v1289_v7, %v1543_v53 }
 0x12c   : > { %v1293_v9 = vpop.eup %1292  ;;  %877 = vst.msk [vmem:[%s1550_s26 + $0x2c] sm:$0xf] %vm865_vm2, %v1074_v47  ;;  %v1072_v17 = vpack.c.bf16 %v714_v12, %v714_v12  ;;  %v719_v58 = vmul.f32 %v1291_v14, %v1554_v20 }
 0x12d   : > { %v1295_v10 = vpop.eup %1294  ;;  %893 = vst.msk [vmem:[%s1550_s26 + $0x6c] sm:$0xf] %vm865_vm2, %v1090_v52  ;;  %v1088_v21 = vpack.c.bf16 %v730_v29, %v730_v29  ;;  %v735_v46 = vmul.f32 %v1293_v9, %v1559_v0 }
 0x12e   : > { %v1297_v15 = vpop.eup %1296  ;;  %875 = vst.msk [vmem:[%s1550_s26 + $0x24] sm:$0xf] %vm865_vm2, %v1072_v17  ;;  %v1077_v22 = vpack.c.bf16 %v719_v58, %v719_v58  ;;  %v653_v25 = vadd.f32 1.0, %v1295_v10 }
 0x12f   : > { %v1299_v53 = vpop.eup %1298  ;;  %891 = vst.msk [vmem:[%s1550_s26 + $0x64] sm:$0xf] %vm865_vm2, %v1088_v21  ;;  %v1093_v30 = vpack.c.bf16 %v735_v46, %v735_v46  ;;  %v669_v32 = vadd.f32 1.0, %v1297_v15 }
 0x130   : > { %v1301_v16 = vpop.eup %1300  ;;  %880 = vst.msk [vmem:[%s1550_s26 + $0x38] sm:$0xf] %vm865_vm2, %v1077_v22  ;;  %1306 = vrcp.f32 %v653_v25  ;;  %v656_v20 = vadd.f32 1.0, %v1299_v53 }
 0x131   : > { %v1303_v35 = vpop.eup %1302  ;;  %896 = vst.msk [vmem:[%s1550_s26 + $0x78] sm:$0xf] %vm865_vm2, %v1093_v30  ;;  %1308 = vrcp.f32 %v669_v32  ;;  %v672_v0 = vadd.f32 1.0, %v1301_v16 }
 0x132   : > { %v1305_v33 = vpop.eup %1304  ;;  %1310 = vrcp.f32 %v656_v20  ;;  %v654_v41 = vadd.f32 1.0, %v1303_v35 }
 0x133   : > { %1312 = vrcp.f32 %v672_v0  ;;  %v670_v44 = vadd.f32 1.0, %v1305_v33 }
 0x134   : > { %1314 = vrcp.f32 %v654_v41 }
 0x135   : > { %1316 = vrcp.f32 %v670_v44 }
 0x13a   : > { %v1307_v40 = vpop.eup %1306 }
 0x13b   : > { %v1309_v18 = vpop.eup %1308  ;;  %v717_v26 = vmul.f32 %v1307_v40, %v1603_v59 }
 0x13c   : > { %v1311_v39 = vpop.eup %1310  ;;  %v733_v48 = vmul.f32 %v1309_v18, %v1607_v24 }
 0x13d   : > { %v1313_v49 = vpop.eup %1312  ;;  %v1075_v51 = vpack.c.bf16 %v717_v26, %v717_v26  ;;  %v720_v45 = vmul.f32 %v1311_v39, %v1611_v28 }
 0x13e   : > { %v1315_v54 = vpop.eup %1314  ;;  %v1091_v31 = vpack.c.bf16 %v733_v48, %v733_v48  ;;  %v736_v55 = vmul.f32 %v1313_v49, %v1615_v4 }
 0x13f   : > { %v1317_v50 = vpop.eup %1316  ;;  %878 = vst.msk [vmem:[%s1550_s26 + $0x30] sm:$0xf] %vm865_vm2, %v1075_v51  ;;  %v1078_v62 = vpack.c.bf16 %v720_v45, %v720_v45  ;;  %v718_v59 = vmul.f32 %v1315_v54, %v1620_v13 }
 0x140   : > { %894 = vst.msk [vmem:[%s1550_s26 + $0x70] sm:$0xf] %vm865_vm2, %v1091_v31  ;;  %v1094_v24 = vpack.c.bf16 %v736_v55, %v736_v55  ;;  %v734_v56 = vmul.f32 %v1317_v50, %v1625_v34 }
 0x141   : > { %881 = vst.msk [vmem:[%s1550_s26 + $0x3c] sm:$0xf] %vm865_vm2, %v1078_v62  ;;  %v1076_v57 = vpack.c.bf16 %v718_v59, %v718_v59 }
 0x142   : > { %897 = vst.msk [vmem:[%s1550_s26 + $0x7c] sm:$0xf] %vm865_vm2, %v1094_v24  ;;  %v1092_v28 = vpack.c.bf16 %v734_v56, %v734_v56 }
 0x143   : > { %879 = vst.msk [vmem:[%s1550_s26 + $0x34] sm:$0xf] %vm865_vm2, %v1076_v57 }
 0x144   : > { %895 = vst.msk [vmem:[%s1550_s26 + $0x74] sm:$0xf] %vm865_vm2, %v1092_v28 }
 0x145 PF: > { %s13_s14 = sadd.s32 1, %s1340_s14   ;;  %s1701_s12 = smov %s1336_s13 }
 0x146   : > { %p10_p5 = scmp.ge.s32.totalorder %s13_s14, 4   ;;  %s1702_s13 = smov %s1704_s15 }
 0x148   :  { %12 = sbr.rel (!%p10_p5) target bundleno = 2 (0x2), region = 62 }

</bundles_post_ra>
